<compile_context>
chip_gen: v7x
topology: tpu7x:2x2x1
jax: 0.10.0
libtpu: 0.0.40
codegen_flags: <defaults>
</compile_context>

<pallas_src>
import jax
import jax.numpy as jnp
from jax.experimental import pallas as pl
from jax.experimental.pallas import tpu as pltpu


def _decoder_row_kernel(xb_ref, h0_ref, c0_ref, wf_ref, y_ref, hn_ref, cn_ref):
    T = y_ref.shape[0]
    H = hn_ref.shape[-1]

    wf = wf_ref[...]                       # (2H, 8H) fused recurrent weights
    h1_init = h0_ref[1]                    # (B, H) layer-1 initial state
    c1_init = c0_ref[1]

    # Lane-stacked wavefront state: [:, :H] = layer-0 state (step s),
    # [:, H:] = layer-1 state (step s-1).
    h = jnp.concatenate([h0_ref[0], h1_init], axis=-1)     # (B, 2H)
    c = jnp.concatenate([c0_ref[0], c1_init], axis=-1)     # (B, 2H)

    def wave(h, c, xb_s):
        # One fused MXU op for both layers' gates: (B,2H) @ (2H,8H).
        # xb_s carries xp[s] (layer-0 cols, incl. b0) and b1 (layer-1 cols).
        gates = jnp.dot(h, wf, preferred_element_type=jnp.float32) + xb_s
        # Gate columns (cell-interleaved, each block 2H wide): i | f | g | o.
        sig = jax.nn.sigmoid(gates)                    # i, f, o (full width)
        g_g = jnp.tanh(gates[:, 4 * H:6 * H])          # g gate only
        i_g = sig[:, 0:2 * H]
        f_g = sig[:, 2 * H:4 * H]
        o_g = sig[:, 6 * H:8 * H]
        c_new = f_g * c + i_g * g_g                    # both cells at once
        h_new = o_g * jnp.tanh(c_new)
        return h_new, c_new

    # Wave 0 (prologue): only the layer-0 half (step 0) is meaningful; the
    # layer-1 half is discarded and the true initial layer-1 state restored.
    h_new, c_new = wave(h, c, xb_ref[0])
    h = jnp.concatenate([h_new[:, 0:H], h1_init], axis=-1)
    c = jnp.concatenate([c_new[:, 0:H], c1_init], axis=-1)

    # Steady-state waves s = 1..T-1: layer-0 step s + layer-1 step s-1.
    # Fully unrolled (T is small and static).
    for s in range(1, T):
        h, c = wave(h, c, xb_ref[s])
        y_ref[s - 1] = h[:, H:2 * H].astype(y_ref.dtype)

    # Final layer-0 state is already step T-1 (before the epilogue wave).
    hn_ref[0] = h[:, 0:H].astype(hn_ref.dtype)
    cn_ref[0] = c[:, 0:H].astype(cn_ref.dtype)

    # Wave T (epilogue): only layer-1 step T-1 is meaningful (xb[T]'s layer-0
    # columns are zero padding; the layer-0 half of the result is discarded).
    h, c = wave(h, c, xb_ref[T])
    y_ref[T - 1] = h[:, H:2 * H].astype(y_ref.dtype)
    hn_ref[1] = h[:, H:2 * H].astype(hn_ref.dtype)
    cn_ref[1] = c[:, H:2 * H].astype(cn_ref.dtype)


def decoder_row_forward(dec_input, h_0, c_0, params):
    """2-layer LSTM forward (eval semantics). Returns (y, (h_n, c_n))."""
    T, B, F = dec_input.shape
    L, B2, H = h_0.shape
    assert L == 2 and B2 == B

    (w_ih0, w_hh0, b0, w_ih1, w_hh1, b1) = params

    # ---- time-independent work, hoisted out of the recurrence (XLA) --------
    # Layer-0 input projection for all T steps, one (T*B,F)x(F,4H) matmul.
    xp = (dec_input.reshape(T * B, F) @ w_ih0.T + b0).reshape(T, B, 4 * H)

    def interleave(a, b):
        # (K, 4H), (K, 4H) -> (K, 8H) with gate-major, cell-interleaved cols
        # [a_i, b_i, a_f, b_f, a_g, b_g, a_o, b_o] (each block width H).
        K = a.shape[0]
        return jnp.stack([a.reshape(K, 4, H), b.reshape(K, 4, H)],
                         axis=2).reshape(K, 8 * H)

    # Per-wave additive term xb (T+1, B, 8H): layer-0 columns carry xp[s]
    # (already includes b0), layer-1 columns carry b1 (constant over time).
    # The extra zero-padded row feeds the epilogue wave.
    xp_pad = jnp.concatenate([xp, jnp.zeros((1, B, 4 * H), xp.dtype)], axis=0)
    xp4 = xp_pad.reshape(T + 1, B, 4, H)
    b14 = jnp.broadcast_to(b1.reshape(1, 1, 4, H), (T + 1, B, 4, H))
    xb = jnp.stack([xp4, b14], axis=3).reshape(T + 1, B, 8 * H)

    # Fused recurrent weight (2H, 8H):
    #   rows 0:H  (applied to h0(s-1)):  whh0 -> layer-0 cols, wih1 -> layer-1
    #   rows H:2H (applied to h1(s-2)):  0    -> layer-0 cols, whh1 -> layer-1
    top = interleave(w_hh0.T, w_ih1.T)
    bot = interleave(jnp.zeros((H, 4 * H), w_hh1.dtype), w_hh1.T)
    w_fused = jnp.concatenate([top, bot], axis=0)          # (2H, 8H)

    vmem = pl.BlockSpec(memory_space=pltpu.MemorySpace.VMEM)

    y, h_n, c_n = pl.pallas_call(
        _decoder_row_kernel,
        out_shape=(
            jax.ShapeDtypeStruct((T, B, H), dec_input.dtype),
            jax.ShapeDtypeStruct((2, B, H), h_0.dtype),
            jax.ShapeDtypeStruct((2, B, H), c_0.dtype),
        ),
        in_specs=[vmem] * 4,
        out_specs=(vmem, vmem, vmem),
        # h_0 -> h_n, c_0 -> c_n: skip two extra HBM allocations/writebacks.
        input_output_aliases={1: 1, 2: 2},
    )(xb, h_0, c_0, w_fused)

    return y, (h_n, c_n)


def init_params(key, in_features, hidden_size):
    """Deterministic PyTorch-style init: U(-1/sqrt(H), 1/sqrt(H))."""
    H = hidden_size
    k = 1.0 / jnp.sqrt(jnp.float32(H))
    ks = jax.random.split(key, 8)
    u = lambda kk, shape: jax.random.uniform(kk, shape, jnp.float32, -k, k)
    w_ih0 = u(ks[0], (4 * H, in_features))
    w_hh0 = u(ks[1], (4 * H, H))
    b0 = (u(ks[2], (1, 4 * H)) + u(ks[3], (1, 4 * H)))  # b_ih + b_hh folded
    w_ih1 = u(ks[4], (4 * H, H))
    w_hh1 = u(ks[5], (4 * H, H))
    b1 = (u(ks[6], (1, 4 * H)) + u(ks[7], (1, 4 * H)))
    return (w_ih0, w_hh0, b0, w_ih1, w_hh1, b1)


def _reference_forward(dec_input, h_0, c_0, params):
    """Pure-JAX reference (lax.scan) for correctness checking."""
    (w_ih0, w_hh0, b0, w_ih1, w_hh1, b1) = params
    H = h_0.shape[-1]

    def cell(x, h, c, w_ih, w_hh, b):
        g = x @ w_ih.T + h @ w_hh.T + b[0]
        i = jax.nn.sigmoid(g[:, 0:H])
        f = jax.nn.sigmoid(g[:, H:2 * H])
        gg = jnp.tanh(g[:, 2 * H:3 * H])
        o = jax.nn.sigmoid(g[:, 3 * H:4 * H])
        c_new = f * c + i * gg
        return o * jnp.tanh(c_new), c_new

    def step(carry, x_t):
        h, c = carry
        h1, c1 = cell(x_t, h[0], c[0], w_ih0, w_hh0, b0)
        h2, c2 = cell(h1, h[1], c[1], w_ih1, w_hh1, b1)
        return (jnp.stack([h1, h2]), jnp.stack([c1, c2])), h2

    (h_n, c_n), y = jax.lax.scan(step, (h_0, c_0), dec_input)
    return y, (h_n, c_n)


if __name__ == "__main__":
    T, B, F, H = 8, 2, 16, 32

    key = jax.random.PRNGKey(0)
    k_x, k_h, k_c, k_p = jax.random.split(key, 4)

    dec_input = jax.random.normal(k_x, (T, B, F), jnp.float32)
    h_0 = jax.random.normal(k_h, (2, B, H), jnp.float32)
    c_0 = jax.random.normal(k_c, (2, B, H), jnp.float32)
    params = init_params(k_p, F, H)

    # Reference first (pure JAX), then the Pallas kernel.
    y_ref, (h_ref, c_ref) = _reference_forward(dec_input, h_0, c_0, params)

    y, (h_n, c_n) = decoder_row_forward(dec_input, h_0, c_0, params)
    jax.block_until_ready((y, h_n, c_n))

    # Tolerance covers f32 reassociation from hoisting the input projection
    # and fusing the layer-1 matmuls (real bugs would show O(0.1-1) errors).
    assert jnp.allclose(y, y_ref, atol=1e-4, rtol=1e-4)
    assert jnp.allclose(h_n, h_ref, atol=1e-4, rtol=1e-4)
    assert jnp.allclose(c_n, c_ref, atol=1e-4, rtol=1e-4)

    print("KERNEL_OK")
</pallas_src>

<mosaic_0001>
module attributes {stable_mosaic.version = 11 : i64} {
  func.func @_decoder_row_kernel(%arg0: memref<9x2x256xf32, #tpu.memory_space<vmem>>, %arg1: memref<2x2x32xf32, #tpu.memory_space<vmem>>, %arg2: memref<2x2x32xf32, #tpu.memory_space<vmem>>, %arg3: memref<64x256xf32, #tpu.memory_space<vmem>>, %arg4: memref<8x2x32xf32, #tpu.memory_space<vmem>>, %arg5: memref<2x2x32xf32, #tpu.memory_space<vmem>>, %arg6: memref<2x2x32xf32, #tpu.memory_space<vmem>>) attributes {dimension_semantics = [], scalar_prefetch = 0 : i64, scratch_operands = 0 : i64, tpu.core_type = #tpu.core_type<tc>} {
    %c0 = arith.constant 0 : index
    %c0_0 = arith.constant 0 : index
    %0 = vector.load %arg3[%c0, %c0_0] : memref<64x256xf32, #tpu.memory_space<vmem>>, vector<64x256xf32>
    %c1 = arith.constant 1 : index
    %c0_1 = arith.constant 0 : index
    %c0_2 = arith.constant 0 : index
    %1 = vector.load %arg1[%c1, %c0_1, %c0_2] : memref<2x2x32xf32, #tpu.memory_space<vmem>>, vector<1x2x32xf32>
    %2 = vector.shape_cast %1 : vector<1x2x32xf32> to vector<2x32xf32>
    %c1_3 = arith.constant 1 : index
    %c0_4 = arith.constant 0 : index
    %c0_5 = arith.constant 0 : index
    %3 = vector.load %arg2[%c1_3, %c0_4, %c0_5] : memref<2x2x32xf32, #tpu.memory_space<vmem>>, vector<1x2x32xf32>
    %4 = vector.shape_cast %3 : vector<1x2x32xf32> to vector<2x32xf32>
    %c0_6 = arith.constant 0 : index
    %c0_7 = arith.constant 0 : index
    %c0_8 = arith.constant 0 : index
    %5 = vector.load %arg1[%c0_6, %c0_7, %c0_8] : memref<2x2x32xf32, #tpu.memory_space<vmem>>, vector<1x2x32xf32>
    %6 = vector.shape_cast %5 : vector<1x2x32xf32> to vector<2x32xf32>
    %7 = tpu.concatenate %6, %2 in 1 : vector<2x32xf32>, vector<2x32xf32> -> vector<2x64xf32>
    %c0_9 = arith.constant 0 : index
    %c0_10 = arith.constant 0 : index
    %c0_11 = arith.constant 0 : index
    %8 = vector.load %arg2[%c0_9, %c0_10, %c0_11] : memref<2x2x32xf32, #tpu.memory_space<vmem>>, vector<1x2x32xf32>
    %9 = vector.shape_cast %8 : vector<1x2x32xf32> to vector<2x32xf32>
    %10 = tpu.concatenate %9, %4 in 1 : vector<2x32xf32>, vector<2x32xf32> -> vector<2x64xf32>
    %c0_12 = arith.constant 0 : index
    %c0_13 = arith.constant 0 : index
    %c0_14 = arith.constant 0 : index
    %11 = vector.load %arg0[%c0_12, %c0_13, %c0_14] : memref<9x2x256xf32, #tpu.memory_space<vmem>>, vector<1x2x256xf32>
    %12 = vector.shape_cast %11 : vector<1x2x256xf32> to vector<2x256xf32>
    %cst = arith.constant dense<0.000000e+00> : vector<2x256xf32>
    %13 = tpu.matmul %7, %0, %cst {dimension_numbers = #tpu.dot_dimension_numbers<[1], [0], [0], [1], [0, 0, 1, 1], [], []>} : vector<2x64xf32>, vector<64x256xf32>, vector<2x256xf32> -> vector<2x256xf32>
    %14 = arith.addf %13, %12 : vector<2x256xf32>
    %15 = arith.negf %14 : vector<2x256xf32>
    %16 = math.exp %15 : vector<2x256xf32>
    %cst_15 = arith.constant 1.000000e+00 : f32
    %17 = vector.broadcast %cst_15 : f32 to vector<2x256xf32>
    %18 = arith.addf %17, %16 : vector<2x256xf32>
    %19 = arith.divf %17, %18 : vector<2x256xf32>
    %20 = vector.extract_strided_slice %14 {offsets = [0, 128], sizes = [2, 64], strides = [1, 1]} : vector<2x256xf32> to vector<2x64xf32>
    %21 = math.tanh %20 : vector<2x64xf32>
    %22 = vector.extract_strided_slice %19 {offsets = [0, 0], sizes = [2, 64], strides = [1, 1]} : vector<2x256xf32> to vector<2x64xf32>
    %23 = vector.extract_strided_slice %19 {offsets = [0, 64], sizes = [2, 64], strides = [1, 1]} : vector<2x256xf32> to vector<2x64xf32>
    %24 = vector.extract_strided_slice %19 {offsets = [0, 192], sizes = [2, 64], strides = [1, 1]} : vector<2x256xf32> to vector<2x64xf32>
    %25 = arith.mulf %23, %10 : vector<2x64xf32>
    %26 = arith.mulf %22, %21 : vector<2x64xf32>
    %27 = arith.addf %25, %26 : vector<2x64xf32>
    %28 = math.tanh %27 : vector<2x64xf32>
    %29 = arith.mulf %24, %28 : vector<2x64xf32>
    %30 = vector.extract_strided_slice %29 {offsets = [0, 0], sizes = [2, 32], strides = [1, 1]} : vector<2x64xf32> to vector<2x32xf32>
    %31 = tpu.concatenate %30, %2 in 1 : vector<2x32xf32>, vector<2x32xf32> -> vector<2x64xf32>
    %32 = vector.extract_strided_slice %27 {offsets = [0, 0], sizes = [2, 32], strides = [1, 1]} : vector<2x64xf32> to vector<2x32xf32>
    %33 = tpu.concatenate %32, %4 in 1 : vector<2x32xf32>, vector<2x32xf32> -> vector<2x64xf32>
    %c1_16 = arith.constant 1 : index
    %c0_17 = arith.constant 0 : index
    %c0_18 = arith.constant 0 : index
    %34 = vector.load %arg0[%c1_16, %c0_17, %c0_18] : memref<9x2x256xf32, #tpu.memory_space<vmem>>, vector<1x2x256xf32>
    %35 = vector.shape_cast %34 : vector<1x2x256xf32> to vector<2x256xf32>
    %cst_19 = arith.constant dense<0.000000e+00> : vector<2x256xf32>
    %36 = tpu.matmul %31, %0, %cst_19 {dimension_numbers = #tpu.dot_dimension_numbers<[1], [0], [0], [1], [0, 0, 1, 1], [], []>} : vector<2x64xf32>, vector<64x256xf32>, vector<2x256xf32> -> vector<2x256xf32>
    %37 = arith.addf %36, %35 : vector<2x256xf32>
    %38 = arith.negf %37 : vector<2x256xf32>
    %39 = math.exp %38 : vector<2x256xf32>
    %cst_20 = arith.constant 1.000000e+00 : f32
    %40 = vector.broadcast %cst_20 : f32 to vector<2x256xf32>
    %41 = arith.addf %40, %39 : vector<2x256xf32>
    %42 = arith.divf %40, %41 : vector<2x256xf32>
    %43 = vector.extract_strided_slice %37 {offsets = [0, 128], sizes = [2, 64], strides = [1, 1]} : vector<2x256xf32> to vector<2x64xf32>
    %44 = math.tanh %43 : vector<2x64xf32>
    %45 = vector.extract_strided_slice %42 {offsets = [0, 0], sizes = [2, 64], strides = [1, 1]} : vector<2x256xf32> to vector<2x64xf32>
    %46 = vector.extract_strided_slice %42 {offsets = [0, 64], sizes = [2, 64], strides = [1, 1]} : vector<2x256xf32> to vector<2x64xf32>
    %47 = vector.extract_strided_slice %42 {offsets = [0, 192], sizes = [2, 64], strides = [1, 1]} : vector<2x256xf32> to vector<2x64xf32>
    %48 = arith.mulf %46, %33 : vector<2x64xf32>
    %49 = arith.mulf %45, %44 : vector<2x64xf32>
    %50 = arith.addf %48, %49 : vector<2x64xf32>
    %51 = math.tanh %50 : vector<2x64xf32>
    %52 = arith.mulf %47, %51 : vector<2x64xf32>
    %53 = vector.extract_strided_slice %52 {offsets = [0, 32], sizes = [2, 32], strides = [1, 1]} : vector<2x64xf32> to vector<2x32xf32>
    %c0_21 = arith.constant 0 : index
    %c0_22 = arith.constant 0 : index
    %c0_23 = arith.constant 0 : index
    %54 = vector.load %arg4[%c0_21, %c0_22, %c0_23] : memref<8x2x32xf32, #tpu.memory_space<vmem>>, vector<1x2x32xf32>
    %55 = vector.shape_cast %54 : vector<1x2x32xf32> to vector<2x32xf32>
    %56 = vector.shape_cast %53 : vector<2x32xf32> to vector<1x2x32xf32>
    tpu.vector_store %arg4[%c0_21, %c0_22, %c0_23], %56 {strides = array<i32>} : memref<8x2x32xf32, #tpu.memory_space<vmem>>, vector<1x2x32xf32>,
    %c2 = arith.constant 2 : index
    %c0_24 = arith.constant 0 : index
    %c0_25 = arith.constant 0 : index
    %57 = vector.load %arg0[%c2, %c0_24, %c0_25] : memref<9x2x256xf32, #tpu.memory_space<vmem>>, vector<1x2x256xf32>
    %58 = vector.shape_cast %57 : vector<1x2x256xf32> to vector<2x256xf32>
    %cst_26 = arith.constant dense<0.000000e+00> : vector<2x256xf32>
    %59 = tpu.matmul %52, %0, %cst_26 {dimension_numbers = #tpu.dot_dimension_numbers<[1], [0], [0], [1], [0, 0, 1, 1], [], []>} : vector<2x64xf32>, vector<64x256xf32>, vector<2x256xf32> -> vector<2x256xf32>
    %60 = arith.addf %59, %58 : vector<2x256xf32>
    %61 = arith.negf %60 : vector<2x256xf32>
    %62 = math.exp %61 : vector<2x256xf32>
    %cst_27 = arith.constant 1.000000e+00 : f32
    %63 = vector.broadcast %cst_27 : f32 to vector<2x256xf32>
    %64 = arith.addf %63, %62 : vector<2x256xf32>
    %65 = arith.divf %63, %64 : vector<2x256xf32>
    %66 = vector.extract_strided_slice %60 {offsets = [0, 128], sizes = [2, 64], strides = [1, 1]} : vector<2x256xf32> to vector<2x64xf32>
    %67 = math.tanh %66 : vector<2x64xf32>
    %68 = vector.extract_strided_slice %65 {offsets = [0, 0], sizes = [2, 64], strides = [1, 1]} : vector<2x256xf32> to vector<2x64xf32>
    %69 = vector.extract_strided_slice %65 {offsets = [0, 64], sizes = [2, 64], strides = [1, 1]} : vector<2x256xf32> to vector<2x64xf32>
    %70 = vector.extract_strided_slice %65 {offsets = [0, 192], sizes = [2, 64], strides = [1, 1]} : vector<2x256xf32> to vector<2x64xf32>
    %71 = arith.mulf %69, %50 : vector<2x64xf32>
    %72 = arith.mulf %68, %67 : vector<2x64xf32>
    %73 = arith.addf %71, %72 : vector<2x64xf32>
    %74 = math.tanh %73 : vector<2x64xf32>
    %75 = arith.mulf %70, %74 : vector<2x64xf32>
    %76 = vector.extract_strided_slice %75 {offsets = [0, 32], sizes = [2, 32], strides = [1, 1]} : vector<2x64xf32> to vector<2x32xf32>
    %c1_28 = arith.constant 1 : index
    %c0_29 = arith.constant 0 : index
    %c0_30 = arith.constant 0 : index
    %77 = vector.load %arg4[%c1_28, %c0_29, %c0_30] : memref<8x2x32xf32, #tpu.memory_space<vmem>>, vector<1x2x32xf32>
    %78 = vector.shape_cast %77 : vector<1x2x32xf32> to vector<2x32xf32>
    %79 = vector.shape_cast %76 : vector<2x32xf32> to vector<1x2x32xf32>
    tpu.vector_store %arg4[%c1_28, %c0_29, %c0_30], %79 {strides = array<i32>} : memref<8x2x32xf32, #tpu.memory_space<vmem>>, vector<1x2x32xf32>,
    %c3 = arith.constant 3 : index
    %c0_31 = arith.constant 0 : index
    %c0_32 = arith.constant 0 : index
    %80 = vector.load %arg0[%c3, %c0_31, %c0_32] : memref<9x2x256xf32, #tpu.memory_space<vmem>>, vector<1x2x256xf32>
    %81 = vector.shape_cast %80 : vector<1x2x256xf32> to vector<2x256xf32>
    %cst_33 = arith.constant dense<0.000000e+00> : vector<2x256xf32>
    %82 = tpu.matmul %75, %0, %cst_33 {dimension_numbers = #tpu.dot_dimension_numbers<[1], [0], [0], [1], [0, 0, 1, 1], [], []>} : vector<2x64xf32>, vector<64x256xf32>, vector<2x256xf32> -> vector<2x256xf32>
    %83 = arith.addf %82, %81 : vector<2x256xf32>
    %84 = arith.negf %83 : vector<2x256xf32>
    %85 = math.exp %84 : vector<2x256xf32>
    %cst_34 = arith.constant 1.000000e+00 : f32
    %86 = vector.broadcast %cst_34 : f32 to vector<2x256xf32>
    %87 = arith.addf %86, %85 : vector<2x256xf32>
    %88 = arith.divf %86, %87 : vector<2x256xf32>
    %89 = vector.extract_strided_slice %83 {offsets = [0, 128], sizes = [2, 64], strides = [1, 1]} : vector<2x256xf32> to vector<2x64xf32>
    %90 = math.tanh %89 : vector<2x64xf32>
    %91 = vector.extract_strided_slice %88 {offsets = [0, 0], sizes = [2, 64], strides = [1, 1]} : vector<2x256xf32> to vector<2x64xf32>
    %92 = vector.extract_strided_slice %88 {offsets = [0, 64], sizes = [2, 64], strides = [1, 1]} : vector<2x256xf32> to vector<2x64xf32>
    %93 = vector.extract_strided_slice %88 {offsets = [0, 192], sizes = [2, 64], strides = [1, 1]} : vector<2x256xf32> to vector<2x64xf32>
    %94 = arith.mulf %92, %73 : vector<2x64xf32>
    %95 = arith.mulf %91, %90 : vector<2x64xf32>
    %96 = arith.addf %94, %95 : vector<2x64xf32>
    %97 = math.tanh %96 : vector<2x64xf32>
    %98 = arith.mulf %93, %97 : vector<2x64xf32>
    %99 = vector.extract_strided_slice %98 {offsets = [0, 32], sizes = [2, 32], strides = [1, 1]} : vector<2x64xf32> to vector<2x32xf32>
    %c2_35 = arith.constant 2 : index
    %c0_36 = arith.constant 0 : index
    %c0_37 = arith.constant 0 : index
    %100 = vector.load %arg4[%c2_35, %c0_36, %c0_37] : memref<8x2x32xf32, #tpu.memory_space<vmem>>, vector<1x2x32xf32>
    %101 = vector.shape_cast %100 : vector<1x2x32xf32> to vector<2x32xf32>
    %102 = vector.shape_cast %99 : vector<2x32xf32> to vector<1x2x32xf32>
    tpu.vector_store %arg4[%c2_35, %c0_36, %c0_37], %102 {strides = array<i32>} : memref<8x2x32xf32, #tpu.memory_space<vmem>>, vector<1x2x32xf32>,
    %c4 = arith.constant 4 : index
    %c0_38 = arith.constant 0 : index
    %c0_39 = arith.constant 0 : index
    %103 = vector.load %arg0[%c4, %c0_38, %c0_39] : memref<9x2x256xf32, #tpu.memory_space<vmem>>, vector<1x2x256xf32>
    %104 = vector.shape_cast %103 : vector<1x2x256xf32> to vector<2x256xf32>
    %cst_40 = arith.constant dense<0.000000e+00> : vector<2x256xf32>
    %105 = tpu.matmul %98, %0, %cst_40 {dimension_numbers = #tpu.dot_dimension_numbers<[1], [0], [0], [1], [0, 0, 1, 1], [], []>} : vector<2x64xf32>, vector<64x256xf32>, vector<2x256xf32> -> vector<2x256xf32>
    %106 = arith.addf %105, %104 : vector<2x256xf32>
    %107 = arith.negf %106 : vector<2x256xf32>
    %108 = math.exp %107 : vector<2x256xf32>
    %cst_41 = arith.constant 1.000000e+00 : f32
    %109 = vector.broadcast %cst_41 : f32 to vector<2x256xf32>
    %110 = arith.addf %109, %108 : vector<2x256xf32>
    %111 = arith.divf %109, %110 : vector<2x256xf32>
    %112 = vector.extract_strided_slice %106 {offsets = [0, 128], sizes = [2, 64], strides = [1, 1]} : vector<2x256xf32> to vector<2x64xf32>
    %113 = math.tanh %112 : vector<2x64xf32>
    %114 = vector.extract_strided_slice %111 {offsets = [0, 0], sizes = [2, 64], strides = [1, 1]} : vector<2x256xf32> to vector<2x64xf32>
    %115 = vector.extract_strided_slice %111 {offsets = [0, 64], sizes = [2, 64], strides = [1, 1]} : vector<2x256xf32> to vector<2x64xf32>
    %116 = vector.extract_strided_slice %111 {offsets = [0, 192], sizes = [2, 64], strides = [1, 1]} : vector<2x256xf32> to vector<2x64xf32>
    %117 = arith.mulf %115, %96 : vector<2x64xf32>
    %118 = arith.mulf %114, %113 : vector<2x64xf32>
    %119 = arith.addf %117, %118 : vector<2x64xf32>
    %120 = math.tanh %119 : vector<2x64xf32>
    %121 = arith.mulf %116, %120 : vector<2x64xf32>
    %122 = vector.extract_strided_slice %121 {offsets = [0, 32], sizes = [2, 32], strides = [1, 1]} : vector<2x64xf32> to vector<2x32xf32>
    %c3_42 = arith.constant 3 : index
    %c0_43 = arith.constant 0 : index
    %c0_44 = arith.constant 0 : index
    %123 = vector.load %arg4[%c3_42, %c0_43, %c0_44] : memref<8x2x32xf32, #tpu.memory_space<vmem>>, vector<1x2x32xf32>
    %124 = vector.shape_cast %123 : vector<1x2x32xf32> to vector<2x32xf32>
    %125 = vector.shape_cast %122 : vector<2x32xf32> to vector<1x2x32xf32>
    tpu.vector_store %arg4[%c3_42, %c0_43, %c0_44], %125 {strides = array<i32>} : memref<8x2x32xf32, #tpu.memory_space<vmem>>, vector<1x2x32xf32>,
    %c5 = arith.constant 5 : index
    %c0_45 = arith.constant 0 : index
    %c0_46 = arith.constant 0 : index
    %126 = vector.load %arg0[%c5, %c0_45, %c0_46] : memref<9x2x256xf32, #tpu.memory_space<vmem>>, vector<1x2x256xf32>
    %127 = vector.shape_cast %126 : vector<1x2x256xf32> to vector<2x256xf32>
    %cst_47 = arith.constant dense<0.000000e+00> : vector<2x256xf32>
    %128 = tpu.matmul %121, %0, %cst_47 {dimension_numbers = #tpu.dot_dimension_numbers<[1], [0], [0], [1], [0, 0, 1, 1], [], []>} : vector<2x64xf32>, vector<64x256xf32>, vector<2x256xf32> -> vector<2x256xf32>
    %129 = arith.addf %128, %127 : vector<2x256xf32>
    %130 = arith.negf %129 : vector<2x256xf32>
    %131 = math.exp %130 : vector<2x256xf32>
    %cst_48 = arith.constant 1.000000e+00 : f32
    %132 = vector.broadcast %cst_48 : f32 to vector<2x256xf32>
    %133 = arith.addf %132, %131 : vector<2x256xf32>
    %134 = arith.divf %132, %133 : vector<2x256xf32>
    %135 = vector.extract_strided_slice %129 {offsets = [0, 128], sizes = [2, 64], strides = [1, 1]} : vector<2x256xf32> to vector<2x64xf32>
    %136 = math.tanh %135 : vector<2x64xf32>
    %137 = vector.extract_strided_slice %134 {offsets = [0, 0], sizes = [2, 64], strides = [1, 1]} : vector<2x256xf32> to vector<2x64xf32>
    %138 = vector.extract_strided_slice %134 {offsets = [0, 64], sizes = [2, 64], strides = [1, 1]} : vector<2x256xf32> to vector<2x64xf32>
    %139 = vector.extract_strided_slice %134 {offsets = [0, 192], sizes = [2, 64], strides = [1, 1]} : vector<2x256xf32> to vector<2x64xf32>
    %140 = arith.mulf %138, %119 : vector<2x64xf32>
    %141 = arith.mulf %137, %136 : vector<2x64xf32>
    %142 = arith.addf %140, %141 : vector<2x64xf32>
    %143 = math.tanh %142 : vector<2x64xf32>
    %144 = arith.mulf %139, %143 : vector<2x64xf32>
    %145 = vector.extract_strided_slice %144 {offsets = [0, 32], sizes = [2, 32], strides = [1, 1]} : vector<2x64xf32> to vector<2x32xf32>
    %c4_49 = arith.constant 4 : index
    %c0_50 = arith.constant 0 : index
    %c0_51 = arith.constant 0 : index
    %146 = vector.load %arg4[%c4_49, %c0_50, %c0_51] : memref<8x2x32xf32, #tpu.memory_space<vmem>>, vector<1x2x32xf32>
    %147 = vector.shape_cast %146 : vector<1x2x32xf32> to vector<2x32xf32>
    %148 = vector.shape_cast %145 : vector<2x32xf32> to vector<1x2x32xf32>
    tpu.vector_store %arg4[%c4_49, %c0_50, %c0_51], %148 {strides = array<i32>} : memref<8x2x32xf32, #tpu.memory_space<vmem>>, vector<1x2x32xf32>,
    %c6 = arith.constant 6 : index
    %c0_52 = arith.constant 0 : index
    %c0_53 = arith.constant 0 : index
    %149 = vector.load %arg0[%c6, %c0_52, %c0_53] : memref<9x2x256xf32, #tpu.memory_space<vmem>>, vector<1x2x256xf32>
    %150 = vector.shape_cast %149 : vector<1x2x256xf32> to vector<2x256xf32>
    %cst_54 = arith.constant dense<0.000000e+00> : vector<2x256xf32>
    %151 = tpu.matmul %144, %0, %cst_54 {dimension_numbers = #tpu.dot_dimension_numbers<[1], [0], [0], [1], [0, 0, 1, 1], [], []>} : vector<2x64xf32>, vector<64x256xf32>, vector<2x256xf32> -> vector<2x256xf32>
    %152 = arith.addf %151, %150 : vector<2x256xf32>
    %153 = arith.negf %152 : vector<2x256xf32>
    %154 = math.exp %153 : vector<2x256xf32>
    %cst_55 = arith.constant 1.000000e+00 : f32
    %155 = vector.broadcast %cst_55 : f32 to vector<2x256xf32>
    %156 = arith.addf %155, %154 : vector<2x256xf32>
    %157 = arith.divf %155, %156 : vector<2x256xf32>
    %158 = vector.extract_strided_slice %152 {offsets = [0, 128], sizes = [2, 64], strides = [1, 1]} : vector<2x256xf32> to vector<2x64xf32>
    %159 = math.tanh %158 : vector<2x64xf32>
    %160 = vector.extract_strided_slice %157 {offsets = [0, 0], sizes = [2, 64], strides = [1, 1]} : vector<2x256xf32> to vector<2x64xf32>
    %161 = vector.extract_strided_slice %157 {offsets = [0, 64], sizes = [2, 64], strides = [1, 1]} : vector<2x256xf32> to vector<2x64xf32>
    %162 = vector.extract_strided_slice %157 {offsets = [0, 192], sizes = [2, 64], strides = [1, 1]} : vector<2x256xf32> to vector<2x64xf32>
    %163 = arith.mulf %161, %142 : vector<2x64xf32>
    %164 = arith.mulf %160, %159 : vector<2x64xf32>
    %165 = arith.addf %163, %164 : vector<2x64xf32>
    %166 = math.tanh %165 : vector<2x64xf32>
    %167 = arith.mulf %162, %166 : vector<2x64xf32>
    %168 = vector.extract_strided_slice %167 {offsets = [0, 32], sizes = [2, 32], strides = [1, 1]} : vector<2x64xf32> to vector<2x32xf32>
    %c5_56 = arith.constant 5 : index
    %c0_57 = arith.constant 0 : index
    %c0_58 = arith.constant 0 : index
    %169 = vector.load %arg4[%c5_56, %c0_57, %c0_58] : memref<8x2x32xf32, #tpu.memory_space<vmem>>, vector<1x2x32xf32>
    %170 = vector.shape_cast %169 : vector<1x2x32xf32> to vector<2x32xf32>
    %171 = vector.shape_cast %168 : vector<2x32xf32> to vector<1x2x32xf32>
    tpu.vector_store %arg4[%c5_56, %c0_57, %c0_58], %171 {strides = array<i32>} : memref<8x2x32xf32, #tpu.memory_space<vmem>>, vector<1x2x32xf32>,
    %c7 = arith.constant 7 : index
    %c0_59 = arith.constant 0 : index
    %c0_60 = arith.constant 0 : index
    %172 = vector.load %arg0[%c7, %c0_59, %c0_60] : memref<9x2x256xf32, #tpu.memory_space<vmem>>, vector<1x2x256xf32>
    %173 = vector.shape_cast %172 : vector<1x2x256xf32> to vector<2x256xf32>
    %cst_61 = arith.constant dense<0.000000e+00> : vector<2x256xf32>
    %174 = tpu.matmul %167, %0, %cst_61 {dimension_numbers = #tpu.dot_dimension_numbers<[1], [0], [0], [1], [0, 0, 1, 1], [], []>} : vector<2x64xf32>, vector<64x256xf32>, vector<2x256xf32> -> vector<2x256xf32>
    %175 = arith.addf %174, %173 : vector<2x256xf32>
    %176 = arith.negf %175 : vector<2x256xf32>
    %177 = math.exp %176 : vector<2x256xf32>
    %cst_62 = arith.constant 1.000000e+00 : f32
    %178 = vector.broadcast %cst_62 : f32 to vector<2x256xf32>
    %179 = arith.addf %178, %177 : vector<2x256xf32>
    %180 = arith.divf %178, %179 : vector<2x256xf32>
    %181 = vector.extract_strided_slice %175 {offsets = [0, 128], sizes = [2, 64], strides = [1, 1]} : vector<2x256xf32> to vector<2x64xf32>
    %182 = math.tanh %181 : vector<2x64xf32>
    %183 = vector.extract_strided_slice %180 {offsets = [0, 0], sizes = [2, 64], strides = [1, 1]} : vector<2x256xf32> to vector<2x64xf32>
    %184 = vector.extract_strided_slice %180 {offsets = [0, 64], sizes = [2, 64], strides = [1, 1]} : vector<2x256xf32> to vector<2x64xf32>
    %185 = vector.extract_strided_slice %180 {offsets = [0, 192], sizes = [2, 64], strides = [1, 1]} : vector<2x256xf32> to vector<2x64xf32>
    %186 = arith.mulf %184, %165 : vector<2x64xf32>
    %187 = arith.mulf %183, %182 : vector<2x64xf32>
    %188 = arith.addf %186, %187 : vector<2x64xf32>
    %189 = math.tanh %188 : vector<2x64xf32>
    %190 = arith.mulf %185, %189 : vector<2x64xf32>
    %191 = vector.extract_strided_slice %190 {offsets = [0, 32], sizes = [2, 32], strides = [1, 1]} : vector<2x64xf32> to vector<2x32xf32>
    %c6_63 = arith.constant 6 : index
    %c0_64 = arith.constant 0 : index
    %c0_65 = arith.constant 0 : index
    %192 = vector.load %arg4[%c6_63, %c0_64, %c0_65] : memref<8x2x32xf32, #tpu.memory_space<vmem>>, vector<1x2x32xf32>
    %193 = vector.shape_cast %192 : vector<1x2x32xf32> to vector<2x32xf32>
    %194 = vector.shape_cast %191 : vector<2x32xf32> to vector<1x2x32xf32>
    tpu.vector_store %arg4[%c6_63, %c0_64, %c0_65], %194 {strides = array<i32>} : memref<8x2x32xf32, #tpu.memory_space<vmem>>, vector<1x2x32xf32>,
    %195 = vector.extract_strided_slice %190 {offsets = [0, 0], sizes = [2, 32], strides = [1, 1]} : vector<2x64xf32> to vector<2x32xf32>
    %c0_66 = arith.constant 0 : index
    %c0_67 = arith.constant 0 : index
    %c0_68 = arith.constant 0 : index
    %196 = vector.load %arg5[%c0_66, %c0_67, %c0_68] : memref<2x2x32xf32, #tpu.memory_space<vmem>>, vector<1x2x32xf32>
    %197 = vector.shape_cast %196 : vector<1x2x32xf32> to vector<2x32xf32>
    %198 = vector.shape_cast %195 : vector<2x32xf32> to vector<1x2x32xf32>
    tpu.vector_store %arg5[%c0_66, %c0_67, %c0_68], %198 {strides = array<i32>} : memref<2x2x32xf32, #tpu.memory_space<vmem>>, vector<1x2x32xf32>,
    %199 = vector.extract_strided_slice %188 {offsets = [0, 0], sizes = [2, 32], strides = [1, 1]} : vector<2x64xf32> to vector<2x32xf32>
    %c0_69 = arith.constant 0 : index
    %c0_70 = arith.constant 0 : index
    %c0_71 = arith.constant 0 : index
    %200 = vector.load %arg6[%c0_69, %c0_70, %c0_71] : memref<2x2x32xf32, #tpu.memory_space<vmem>>, vector<1x2x32xf32>
    %201 = vector.shape_cast %200 : vector<1x2x32xf32> to vector<2x32xf32>
    %202 = vector.shape_cast %199 : vector<2x32xf32> to vector<1x2x32xf32>
    tpu.vector_store %arg6[%c0_69, %c0_70, %c0_71], %202 {strides = array<i32>} : memref<2x2x32xf32, #tpu.memory_space<vmem>>, vector<1x2x32xf32>,
    %c8 = arith.constant 8 : index
    %c0_72 = arith.constant 0 : index
    %c0_73 = arith.constant 0 : index
    %203 = vector.load %arg0[%c8, %c0_72, %c0_73] : memref<9x2x256xf32, #tpu.memory_space<vmem>>, vector<1x2x256xf32>
    %204 = vector.shape_cast %203 : vector<1x2x256xf32> to vector<2x256xf32>
    %cst_74 = arith.constant dense<0.000000e+00> : vector<2x256xf32>
    %205 = tpu.matmul %190, %0, %cst_74 {dimension_numbers = #tpu.dot_dimension_numbers<[1], [0], [0], [1], [0, 0, 1, 1], [], []>} : vector<2x64xf32>, vector<64x256xf32>, vector<2x256xf32> -> vector<2x256xf32>
    %206 = arith.addf %205, %204 : vector<2x256xf32>
    %207 = arith.negf %206 : vector<2x256xf32>
    %208 = math.exp %207 : vector<2x256xf32>
    %cst_75 = arith.constant 1.000000e+00 : f32
    %209 = vector.broadcast %cst_75 : f32 to vector<2x256xf32>
    %210 = arith.addf %209, %208 : vector<2x256xf32>
    %211 = arith.divf %209, %210 : vector<2x256xf32>
    %212 = vector.extract_strided_slice %206 {offsets = [0, 128], sizes = [2, 64], strides = [1, 1]} : vector<2x256xf32> to vector<2x64xf32>
    %213 = math.tanh %212 : vector<2x64xf32>
    %214 = vector.extract_strided_slice %211 {offsets = [0, 0], sizes = [2, 64], strides = [1, 1]} : vector<2x256xf32> to vector<2x64xf32>
    %215 = vector.extract_strided_slice %211 {offsets = [0, 64], sizes = [2, 64], strides = [1, 1]} : vector<2x256xf32> to vector<2x64xf32>
    %216 = vector.extract_strided_slice %211 {offsets = [0, 192], sizes = [2, 64], strides = [1, 1]} : vector<2x256xf32> to vector<2x64xf32>
    %217 = arith.mulf %215, %188 : vector<2x64xf32>
    %218 = arith.mulf %214, %213 : vector<2x64xf32>
    %219 = arith.addf %217, %218 : vector<2x64xf32>
    %220 = math.tanh %219 : vector<2x64xf32>
    %221 = arith.mulf %216, %220 : vector<2x64xf32>
    %222 = vector.extract_strided_slice %221 {offsets = [0, 32], sizes = [2, 32], strides = [1, 1]} : vector<2x64xf32> to vector<2x32xf32>
    %c7_76 = arith.constant 7 : index
    %c0_77 = arith.constant 0 : index
    %c0_78 = arith.constant 0 : index
    %223 = vector.load %arg4[%c7_76, %c0_77, %c0_78] : memref<8x2x32xf32, #tpu.memory_space<vmem>>, vector<1x2x32xf32>
    %224 = vector.shape_cast %223 : vector<1x2x32xf32> to vector<2x32xf32>
    %225 = vector.shape_cast %222 : vector<2x32xf32> to vector<1x2x32xf32>
    tpu.vector_store %arg4[%c7_76, %c0_77, %c0_78], %225 {strides = array<i32>} : memref<8x2x32xf32, #tpu.memory_space<vmem>>, vector<1x2x32xf32>,
    %226 = vector.extract_strided_slice %221 {offsets = [0, 32], sizes = [2, 32], strides = [1, 1]} : vector<2x64xf32> to vector<2x32xf32>
    %c1_79 = arith.constant 1 : index
    %c0_80 = arith.constant 0 : index
    %c0_81 = arith.constant 0 : index
    %227 = vector.load %arg5[%c1_79, %c0_80, %c0_81] : memref<2x2x32xf32, #tpu.memory_space<vmem>>, vector<1x2x32xf32>
    %228 = vector.shape_cast %227 : vector<1x2x32xf32> to vector<2x32xf32>
    %229 = vector.shape_cast %226 : vector<2x32xf32> to vector<1x2x32xf32>
    tpu.vector_store %arg5[%c1_79, %c0_80, %c0_81], %229 {strides = array<i32>} : memref<2x2x32xf32, #tpu.memory_space<vmem>>, vector<1x2x32xf32>,
    %230 = vector.extract_strided_slice %219 {offsets = [0, 32], sizes = [2, 32], strides = [1, 1]} : vector<2x64xf32> to vector<2x32xf32>
    %c1_82 = arith.constant 1 : index
    %c0_83 = arith.constant 0 : index
    %c0_84 = arith.constant 0 : index
    %231 = vector.load %arg6[%c1_82, %c0_83, %c0_84] : memref<2x2x32xf32, #tpu.memory_space<vmem>>, vector<1x2x32xf32>
    %232 = vector.shape_cast %231 : vector<1x2x32xf32> to vector<2x32xf32>
    %233 = vector.shape_cast %230 : vector<2x32xf32> to vector<1x2x32xf32>
    tpu.vector_store %arg6[%c1_82, %c0_83, %c0_84], %233 {strides = array<i32>} : memref<2x2x32xf32, #tpu.memory_space<vmem>>, vector<1x2x32xf32>,
    return
  }
}

</mosaic_0001>

<bundles_post_ra>
// kernel: tpu_custom_call.1
= control target key start
LH: loop header
LB: loop body
LE: loop exit
PB: predicated region body
PF: predicated region fallthrough
CT: control target
= control target key end

     0   :  { %12 = vsyncpa [#allocation3], 0  ;;  %s2040_s0 = inlined_call_operand.hbm [shape: f32[9,2,256], index: 0, kind: input, shape index: {}]   ;;  %s2041_s1 = inlined_call_operand.hbm [shape: f32[2,2,32], index: 1, kind: input, shape index: {}, may-alias: {1,5}]   ;;  %s2042_s2 = inlined_call_operand.hbm [shape: f32[2,2,32], index: 2, kind: input, shape index: {}, may-alias: {2,6}]   ;;  %s2043_s3 = inlined_call_operand.hbm [shape: f32[64,256], index: 3, kind: input, shape index: {}]   ;;  %s2044_s4 = inlined_call_operand.hbm [shape: f32[8,2,32], index: 4, kind: output, shape index: {0}]   ;;  %s2045_s5 = inlined_call_operand.hbm [shape: f32[2,2,32], index: 5, kind: output, shape index: {1}, may-alias: {1,5}]   ;;  %s2046_s6 = inlined_call_operand.hbm [shape: f32[2,2,32], index: 6, kind: output, shape index: {2}, may-alias: {2,6}]  }
   0x1   :  { %13 = vsyncpa [#allocation6], 0 }
   0x2   :  { %14 = vsyncpa [#allocation9], 0 }
   0x3   :  { %15 = vsyncpa [#allocation4], 0 }
   0x4   :  { %16 = vsyncpa [#allocation12], 0  ;;  %s1695_s21 = smov [#allocation5]   ;;  %s1531_s25 = scalar_lea.hbm %s2041_s1, 64 }
   0x5   :  { %s34_s22 = sshll.u32 %s1695_s21, 4  ;;  %p1532_p0 = scmp.ne.s32.totalorder %s2041_s1, %s1531_s25  ;;  %s35_s22 = int_to_ptr.vmem [resolvable:$true] %s34_s22 }
   0x6   :  { %p1535_p1 = scmp.lt.u32.totalorder %s1531_s25, %s2041_s1 }
   0x8   :  { %p1537_p2 = pnand %p1535_p1, %p1532_p0 }
   0xa   :  { %1540 = shalt.err (!%p1537_p2)
}
   0xb   :  { %s1541_s30 = scalar_lea.vmem %s35_s22, 64  ;;  %p1546_p4 = scmp.lt.s32.totalorder %s35_s22, %s35_s22 }
   0xc   :  { %p1542_p3 = scmp.ne.s32.totalorder %s35_s22, %s1541_s30  ;;  %p1547_p5 = scmp.lt.s32.totalorder %s1541_s30, %s1541_s30 }
   0xe   :  { %p1548_p6 = por %p1547_p5, %p1546_p4 }
  0x10   :  { %p1549_p7 = pnand %p1548_p6, %p1542_p3 }
  0x12   :  { %1552 = shalt.err (!%p1549_p7)
}
  0x13   :  { %s1696_s7 = smov 32   ;;  %s1697_s8 = smov 2  }
  0x14   :  { %40 = dma.hbm_to_vmem [thread:$0]  %s2041_s1, 64, %s35_s22, [#allocation6], %s1696_s7, %s1696_s7, %s1697_s8  }
  0x15   :  { %s1698_s11 = smov [#allocation2]   ;;  %s1553_s15 = scalar_lea.hbm %s2040_s0, 576 }
  0x16   :  { %s22_s12 = sshll.u32 %s1698_s11, 4  ;;  %p1554_p8 = scmp.ne.s32.totalorder %s2040_s0, %s1553_s15  ;;  %s23_s12 = int_to_ptr.vmem [resolvable:$true] %s22_s12 }
  0x17   :  { %p1557_p9 = scmp.lt.u32.totalorder %s1553_s15, %s2040_s0 }
  0x19   :  { %p1559_p10 = pnand %p1557_p9, %p1554_p8 }
  0x1b   :  { %1562 = shalt.err (!%p1559_p10)
}
  0x1c   :  { %s1563_s20 = scalar_lea.vmem %s23_s12, 576  ;;  %p1568_p12 = scmp.lt.s32.totalorder %s23_s12, %s23_s12 }
  0x1d   :  { %p1564_p11 = scmp.ne.s32.totalorder %s23_s12, %s1563_s20  ;;  %p1569_p13 = scmp.lt.s32.totalorder %s1563_s20, %s1563_s20 }
  0x1f   :  { %p1570_p0 = por %p1569_p13, %p1568_p12 }
  0x21   :  { %p1571_p1 = pnand %p1570_p0, %p1564_p11 }
  0x23   :  { %1574 = shalt.err (!%p1571_p1)
}
  0x24   :  { %s1699_s1 = smov 64   ;;  %s1700_s21 = smov 4  }
  0x25   :  { %28 = dma.hbm_to_vmem [thread:$0]  %s2040_s0, 576, %s23_s12, [#allocation3], %s1699_s1, %s1699_s1, %s1700_s21  }
  0x26   :  { %s1701_s24 = smov [#allocation7]   ;;  %s1702_s26 = smov [#allocation8]  }
  0x27   :  { %s46_s25 = sshll.u32 %s1701_s24, 4  ;;  %s58_s27 = sshll.u32 %s1702_s26, 4  ;;  %s47_s25 = int_to_ptr.vmem [resolvable:$true] %s46_s25  ;;  %s1773_s27 = int_to_ptr.vmem [resolvable:$true] %s58_s27 }
  0x28   :  { %s1575_s30 = scalar_lea.hbm %s2042_s2, 64 }
  0x29   :  { %p1576_p2 = scmp.ne.s32.totalorder %s2042_s2, %s1575_s30  ;;  %p1579_p3 = scmp.lt.u32.totalorder %s1575_s30, %s2042_s2 }
  0x2b   :  { %p1581_p4 = pnand %p1579_p3, %p1576_p2 }
  0x2d   :  { %1584 = shalt.err (!%p1581_p4)
}
  0x2e   :  { %s1585_s0 = scalar_lea.vmem %s47_s25, 64  ;;  %p1590_p6 = scmp.lt.s32.totalorder %s47_s25, %s47_s25 }
  0x2f   :  { %p1586_p5 = scmp.ne.s32.totalorder %s47_s25, %s1585_s0  ;;  %p1591_p7 = scmp.lt.s32.totalorder %s1585_s0, %s1585_s0 }
  0x31   :  { %p1592_p8 = por %p1591_p7, %p1590_p6 }
  0x33   :  { %p1593_p9 = pnand %p1592_p8, %p1586_p5 }
  0x35   :  { %1596 = shalt.err (!%p1593_p9)
}
  0x36   :  { %52 = dma.hbm_to_vmem [thread:$0]  %s2042_s2, 64, %s47_s25, [#allocation6], %s1696_s7, %s1696_s7, %s1697_s8  }
  0x37   :  { %s1597_s17 = scalar_lea.hbm %s2043_s3, 2048 }
  0x38   :  { %p1598_p10 = scmp.ne.s32.totalorder %s2043_s3, %s1597_s17  ;;  %p1601_p11 = scmp.lt.u32.totalorder %s1597_s17, %s2043_s3 }
  0x3a   :  { %p1603_p12 = pnand %p1601_p11, %p1598_p10 }
  0x3c   :  { %1606 = shalt.err (!%p1603_p12)
}
  0x3d   :  { %s1607_s22 = scalar_lea.vmem %s1773_s27, 2048  ;;  %p1612_p0 = scmp.lt.s32.totalorder %s1773_s27, %s1773_s27 }
  0x3e   :  { %p1608_p13 = scmp.ne.s32.totalorder %s1773_s27, %s1607_s22  ;;  %p1613_p1 = scmp.lt.s32.totalorder %s1607_s22, %s1607_s22 }
  0x40   :  { %p1614_p2 = por %p1613_p1, %p1612_p0 }
  0x42   :  { %p1615_p3 = pnand %p1614_p2, %p1608_p13 }
  0x44   :  { %1618 = shalt.err (!%p1615_p3)
}
  0x45   :  { %s1703_s2 = smov 256   ;;  %s1704_s23 = smov 16  }
  0x46   :  { %64 = dma.hbm_to_vmem [thread:$0]  %s2043_s3, 2048, %s1773_s27, [#allocation9], %s1703_s2, %s1703_s2, %s1704_s23  }
  0x47   :  { %1685 = dma.done.wait [#allocation3], 576  }
  0x48   :  { %1686 = vsyncadd [#allocation3], 4294966720 }
  0x49   :  { %1687 = dma.done.wait [#allocation6], 128  }
  0x4a   :  { %1688 = vsyncadd [#allocation6], 4294967168 }
  0x4b   :  { %1689 = dma.done.wait [#allocation9], 2048  }
  0x4c   :  { %1690 = vsyncadd [#allocation9], 4294965248  ;;  %v1705_v0 = vmov 0.0   ;;  %v94_v1 = vld [vmem:[#allocation5 + $0x2] sm:$0x3]  ;;  %v78_v2 = vld [vmem:[#allocation8 + $0x8] sm:$0xff] }
  0x4d   :  { %190 = vmatprep.mubr.f32.mxu0 %v1705_v0  ;;  %313 = vmatprep.mubr.f32.mxu1 %v1705_v0  ;;  %v80_v3 = vld [vmem:[#allocation8 + $0x18] sm:$0xff]  ;;  %v77_v5 = vld [vmem:[#allocation8] sm:$0xff]  ;;  %v79_v6 = vld [vmem:[#allocation8 + $0x10] sm:$0xff]  ;;  %vm102_vm0 = vcmask 261120   ;;  %vm122_vm1 = vcmask 523264   ;;  %vm350_vm2 = vcmask 254976  }
  0x4e   :  { %99 = vrot.lane.b32.xlu0 %v94_v1, %s1696_s7  ;;  %v1810_v4 = vpack.c.bf16 %v80_v3, %v78_v2  ;;  %v82_v7 = vld [vmem:[#allocation8 + $0x28] sm:$0xff]  ;;  %v1812_v8 = vpack.c.bf16 %v79_v6, %v77_v5  ;;  %v84_v9 = vld [vmem:[#allocation8 + $0x38] sm:$0xff]  ;;  %v81_v10 = vld [vmem:[#allocation8 + $0x20] sm:$0xff]  ;;  %s1706_s3 = smov [#allocation11]   ;;  %s1707_s27 = smov [#allocation10]  }
  0x4f   :  { %v83_v11 = vld [vmem:[#allocation8 + $0x30] sm:$0xff]  ;;  %v1815_v12 = vpack.c.bf16 %v84_v9, %v82_v7  ;;  %v86_v13 = vld [vmem:[#allocation8 + $0x48] sm:$0xff]  ;;  %v88_v14 = vld [vmem:[#allocation8 + $0x58] sm:$0xff]  ;;  %s1196_s26 = sshll.u32 %s1706_s3, 4  ;;  %s1184_s28 = sshll.u32 %s1707_s27, 4  ;;  %s1197_s26 = int_to_ptr.vmem [resolvable:$true] %s1196_s26  ;;  %s1978_s28 = int_to_ptr.vmem [resolvable:$true] %s1184_s28 }
  0x50   :  { %1266 = vmatprep.subr.bf16.mxu0 %v1810_v4  ;;  %1282 = vmatprep.subr.bf16.mxu1 %v1810_v4  ;;  %v1819_v15 = vpack.c.bf16 %v83_v11, %v81_v10  ;;  %v1823_v16 = vpack.c.bf16 %v88_v14, %v86_v13  ;;  %v85_v17 = vld [vmem:[#allocation8 + $0x40] sm:$0xff]  ;;  %v87_v18 = vld [vmem:[#allocation8 + $0x50] sm:$0xff]  ;;  %v90_v19 = vld [vmem:[#allocation8 + $0x68] sm:$0xff]  ;;  %s1708_s29 = smov [#allocation13]   ;;  %p1624_p5 = scmp.lt.s32.totalorder %s1197_s26, %s1197_s26 }
  0x51   :  { %1268 = vmatpush1.bf16.msra.mxu0 %v1812_v8  ;;  %1284 = vmatpush1.bf16.msra.mxu1 %v1812_v8  ;;  %v92_v20 = vld [vmem:[#allocation8 + $0x78] sm:$0xff]  ;;  %v1828_v22 = vpack.c.bf16 %v87_v18, %v85_v17  ;;  %v89_v24 = vld [vmem:[#allocation8 + $0x60] sm:$0xff]  ;;  %v91_v25 = vld [vmem:[#allocation8 + $0x70] sm:$0xff]  ;;  %s1208_s30 = sshll.u32 %s1708_s29, 4  ;;  %s1982_s30 = int_to_ptr.vmem [resolvable:$true] %s1208_s30 }
  0x52   :  { %1270 = vmatprep.subr.bf16.mxu0 %v1815_v12  ;;  %1286 = vmatprep.subr.bf16.mxu1 %v1815_v12  ;;  %v96_v21 = vld [vmem:[#allocation7 + $0x2] sm:$0x3]  ;;  %v1832_v23 = vpack.c.bf16 %v92_v20, %v90_v19  ;;  %v1836_v26 = vpack.c.bf16 %v91_v25, %v89_v24  ;;  %v97_v27 = vld [vmem:[#allocation5] sm:$0x3]  ;;  %v104_v30 = vld [vmem:[#allocation7] sm:$0x3] }
  0x53   :  { %106 = vrot.lane.b32.xlu0 %v96_v21, %s1696_s7  ;;  %v1229_v33 = vld.sshfl [vmem:[#allocation2] sm:$0x33 pattern:$0x76325410] }
  0x54   :  { %v119_v38 = vcombine.high %v1229_v33, %v1229_v33  ;;  %v1233_v59 = vld.sshfl [vmem:[#allocation2 + $0x4] sm:$0x33 pattern:$0x76325410] }
  0x55   :  { %1272 = vmatpush1.bf16.msra.mxu0 %v1819_v15  ;;  %1288 = vmatpush1.bf16.msra.mxu1 %v1819_v15  ;;  %v243_v1 = vcombine.high %v1233_v59, %v1233_v59 }
  0x56   :  { %1274 = vmatprep.subr.bf16.mxu0 %v1823_v16  ;;  %1290 = vmatprep.subr.bf16.mxu1 %v1823_v16 }
  0x59   :  { %1276 = vmatpush1.bf16.msra.mxu0 %v1828_v22  ;;  %1292 = vmatpush1.bf16.msra.mxu1 %v1828_v22 }
  0x5a   :  { %1278 = vmatprep.subr.bf16.mxu0 %v1832_v23  ;;  %1294 = vmatprep.subr.bf16.mxu1 %v1832_v23 }
  0x5d   :  { %1280 = vmatpush1.bf16.msra.mxu0 %v1836_v26  ;;  %1296 = vmatpush1.bf16.msra.mxu1 %v1836_v26 }
  0x5e   :  { %1298 = vmatprep.subr.bf16.mxu0 %v1810_v4  ;;  %1314 = vmatprep.subr.bf16.mxu1 %v1810_v4 }
  0xc0   :  { %v100_v28 = vpop.permute.xlu0 %99 }
  0xc1   :  { %v103_v29 = vsel %vm102_vm0, %v97_v27, %v100_v28  ;;  %v1237_v27 = vld.sshfl [vmem:[#allocation2 + $0x8] sm:$0x33 pattern:$0x76325410] }
  0xc2   :  { %1230 = vmatmul.mubr.msk.f32.vlgmr.msra.gmra.mrb[0].mxu0 %vm122_vm1, %v103_v29 }
  0xc3   :  { %1300 = vmatpush1.bf16.msra.mxu0 %v1812_v8  ;;  %433 = vmatprep.mubr.f32.mxu0 %v1705_v0 }
  0xc4   :  { %1302 = vmatprep.subr.bf16.mxu0 %v1815_v12 }
  0xc5   :  { %v107_v31 = vpop.permute.xlu0 %106 }
  0xc6   :  { %v109_v32 = vsel %vm102_vm0, %v104_v30, %v107_v31 }
  0xc7   :  { %1304 = vmatpush1.bf16.msra.mxu0 %v1819_v15  ;;  %211 = vrot.lane.b32.xlu1 %v109_v32, %s1699_s1  ;;  %v364_v32 = vcombine.high %v1237_v27, %v1237_v27 }
  0xc8   :  { %1306 = vmatprep.subr.bf16.mxu0 %v1823_v16 }
  0xcb   :  { %1308 = vmatpush1.bf16.msra.mxu0 %v1828_v22 }
  0xcc   :  { %1310 = vmatprep.subr.bf16.mxu0 %v1832_v23 }
  0xcf   :  { %1312 = vmatpush1.bf16.msra.mxu0 %v1836_v26 }
  0xd0   :  { %1330 = vmatprep.subr.bf16.mxu0 %v1810_v4 }
 0x139   :  { %v212_v47 = vpop.permute.xlu1 %211 }
 0x195   :  { %v192_v34 = vpop.f32.mrb[0].mxu0 }
 0x196   :  { %v193_v35 = vadd.f32 %v1229_v33, %v192_v34  ;;  %v194_v36 = vpop.f32.mrb[1].mxu0 }
 0x197   :  { %v195_v39 = vadd.f32 %v194_v36, %v119_v38 }
 0x198   :  { %v1231_v37 = vmul.f32 -1.442695, %v193_v35 }
 0x199   :  { %v1232_v45 = vmul.f32 -1.442695, %v195_v39 }
 0x19a   :  { %1423 = vpow2.f32 %v1231_v37 }
 0x19b   :  { %1425 = vtanh.f32 %v195_v39 }
 0x1a4   :  { %v1424_v40 = vpop.eup %1423 }
 0x1a5   :  { %v203_v41 = vadd.f32 1.0, %v1424_v40  ;;  %v1426_v42 = vpop.eup %1425 }
 0x1a7   :  { %1427 = vrcp.f32 %v203_v41 }
 0x1a8   :  { %1429 = vpow2.f32 %v1232_v45 }
 0x1b1   :  { %v1428_v43 = vpop.eup %1427 }
 0x1b2   :  { %v215_v44 = vmul.f32 %v1428_v43, %v1426_v42  ;;  %v1430_v46 = vpop.eup %1429  ;;  %v214_v49 = vmul.f32 %v1428_v43, %v212_v47 }
 0x1b3   :  { %v204_v48 = vadd.f32 1.0, %v1430_v46 }
 0x1b4   :  { %217 = vrot.lane.b32.xlu1 %v215_v44, %s1699_s1 }
 0x1b5   :  { %1431 = vrcp.f32 %v204_v48 }
 0x1bf   :  { %v1432_v52 = vpop.eup %1431 }
 0x226   :  { %v218_v50 = vpop.permute.xlu1 %217 }
 0x227   :  { %v220_v51 = vadd.f32 %v218_v50, %v214_v49  ;;  %v1241_v49 = vld.sshfl [vmem:[#allocation2 + $0xc] sm:$0x33 pattern:$0x76325410] }
 0x229   :  { %1433 = vtanh.f32 %v220_v51  ;;  %229 = vrot.lane.b32.xlu1 %v220_v51, %s1699_s1 }
 0x233   :  { %v1434_v53 = vpop.eup %1433 }
 0x234   :  { %v222_v54 = vmul.f32 %v1434_v53, %v1432_v52 }
 0x236   :  { %224 = vrot.lane.b32.xlu0 %v222_v54, %s1699_s1  ;;  %v480_v54 = vcombine.high %v1241_v49, %v1241_v49 }
 0x29b   :  { %v230_v55 = vpop.permute.xlu1 %229 }
 0x29c   :  { %v232_v56 = vsel %vm102_vm0, %v230_v55, %v107_v31 }
 0x29d   :  { %334 = vrot.lane.b32.xlu0 %v232_v56, %s1699_s1 }
 0x2a8   :  { %v225_v57 = vpop.permute.xlu0 %224 }
 0x2a9   :  { %v227_v58 = vsel %vm102_vm0, %v225_v57, %v100_v28 }
 0x2aa   :  { %1234 = vmatmul.mubr.msk.f32.vlgmr.msra.gmra.mrb[0].mxu1 %vm122_vm1, %v227_v58 }
 0x2ab   :  { %1316 = vmatpush1.bf16.msra.mxu1 %v1812_v8  ;;  %549 = vmatprep.mubr.f32.mxu1 %v1705_v0 }
 0x2ac   :  { %1318 = vmatprep.subr.bf16.mxu1 %v1815_v12 }
 0x2af   :  { %1320 = vmatpush1.bf16.msra.mxu1 %v1819_v15 }
 0x2b0   :  { %1322 = vmatprep.subr.bf16.mxu1 %v1823_v16 }
 0x2b3   :  { %1324 = vmatpush1.bf16.msra.mxu1 %v1828_v22 }
 0x2b4   :  { %1326 = vmatprep.subr.bf16.mxu1 %v1832_v23 }
 0x2b7   :  { %1328 = vmatpush1.bf16.msra.mxu1 %v1836_v26 }
 0x2b8   :  { %1346 = vmatprep.subr.bf16.mxu1 %v1810_v4 }
 0x30f   :  { %v335_v13 = vpop.permute.xlu0 %334 }
 0x37d   :  { %v315_v60 = vpop.f32.mrb[0].mxu1 }
 0x37e   :  { %v316_v61 = vadd.f32 %v1233_v59, %v315_v60  ;;  %v317_v62 = vpop.f32.mrb[1].mxu1 }
 0x37f   :  { %v318_v2 = vadd.f32 %v317_v62, %v243_v1 }
 0x380   :  { %v1235_v63 = vmul.f32 -1.442695, %v316_v61 }
 0x381   :  { %v1236_v10 = vmul.f32 -1.442695, %v318_v2 }
 0x382   :  { %1435 = vpow2.f32 %v1235_v63 }
 0x383   :  { %1437 = vtanh.f32 %v318_v2 }
 0x38c   :  { %v1436_v3 = vpop.eup %1435 }
 0x38d   :  { %v326_v5 = vadd.f32 1.0, %v1436_v3  ;;  %v1438_v6 = vpop.eup %1437 }
 0x38f   :  { %1439 = vrcp.f32 %v326_v5 }
 0x390   :  { %1441 = vpow2.f32 %v1236_v10  ;;  %v1245_v10 = vld.sshfl [vmem:[#allocation2 + $0x10] sm:$0x33 pattern:$0x76325410] }
 0x399   :  { %v1440_v7 = vpop.eup %1439 }
 0x39a   :  { %v338_v9 = vmul.f32 %v1440_v7, %v1438_v6  ;;  %v1442_v11 = vpop.eup %1441  ;;  %v337_v17 = vmul.f32 %v1440_v7, %v335_v13 }
 0x39b   :  { %v327_v14 = vadd.f32 1.0, %v1442_v11 }
 0x39c   :  { %340 = vrot.lane.b32.xlu1 %v338_v9, %s1699_s1 }
 0x39d   :  { %1443 = vrcp.f32 %v327_v14 }
 0x3a7   :  { %v1444_v20 = vpop.eup %1443 }
 0x40e   :  { %v341_v18 = vpop.permute.xlu1 %340 }
 0x40f   :  { %v343_v19 = vadd.f32 %v341_v18, %v337_v17  ;;  %v596_v18 = vcombine.high %v1245_v10, %v1245_v10 }
 0x411   :  { %1445 = vtanh.f32 %v343_v19 }
 0x41b   :  { %v1446_v21 = vpop.eup %1445 }
 0x41c   :  { %v1875_v24 = vmul.f32 %v1446_v21, %v1444_v20 }
 0x41e   :  { %354 = vrot.lane.b32.xlu0 %v1875_v24, %s1699_s1 }
 0x490   :  { %v355_v25 = vpop.permute.xlu0 %354 }
 0x491   :  { %1238 = vmatmul.mubr.msk.f32.vlgmr.msra.gmra.mrb[2].mxu0 %vm122_vm1, %v355_v25 }
 0x492   :  { %1332 = vmatpush1.bf16.msra.mxu0 %v1812_v8  ;;  %665 = vmatprep.mubr.f32.mxu0 %v1705_v0 }
 0x493   :  { %1334 = vmatprep.subr.bf16.mxu0 %v1815_v12 }
 0x496   :  { %1336 = vmatpush1.bf16.msra.mxu0 %v1819_v15 }
 0x497   :  { %1338 = vmatprep.subr.bf16.mxu0 %v1823_v16 }
 0x49a   :  { %1340 = vmatpush1.bf16.msra.mxu0 %v1828_v22 }
 0x49b   :  { %1342 = vmatprep.subr.bf16.mxu0 %v1832_v23 }
 0x49e   :  { %1344 = vmatpush1.bf16.msra.mxu0 %v1836_v26 }
 0x49f   :  { %1362 = vmatprep.subr.bf16.mxu0 %v1810_v4 }
 0x564   :  { %v435_v28 = vpop.f32.mrb[2].mxu0 }
 0x565   :  { %v436_v29 = vadd.f32 %v1237_v27, %v435_v28  ;;  %v437_v30 = vpop.f32.mrb[3].mxu0 }
 0x566   :  { %v438_v33 = vadd.f32 %v437_v30, %v364_v32 }
 0x567   :  { %v1239_v31 = vmul.f32 -1.442695, %v436_v29 }
 0x568   :  { %v1240_v39 = vmul.f32 -1.442695, %v438_v33 }
 0x569   :  { %1447 = vpow2.f32 %v1239_v31 }
 0x56a   :  { %1449 = vtanh.f32 %v438_v33 }
 0x573   :  { %v1448_v34 = vpop.eup %1447 }
 0x574   :  { %v446_v35 = vadd.f32 1.0, %v1448_v34  ;;  %v1450_v36 = vpop.eup %1449 }
 0x576   :  { %1451 = vrcp.f32 %v446_v35 }
 0x577   :  { %1453 = vpow2.f32 %v1240_v39 }
 0x580   :  { %v1452_v37 = vpop.eup %1451 }
 0x581   :  { %v454_v38 = vmul.f32 %v1452_v37, %v1450_v36  ;;  %v1454_v40 = vpop.eup %1453  ;;  %v453_v42 = vmul.f32 %v1452_v37, %v343_v19 }
 0x582   :  { %v447_v41 = vadd.f32 1.0, %v1454_v40 }
 0x583   :  { %456 = vrot.lane.b32.xlu1 %v454_v38, %s1699_s1  ;;  %v1249_v38 = vld.sshfl [vmem:[#allocation2 + $0x14] sm:$0x33 pattern:$0x76325410] }
 0x584   :  { %1455 = vrcp.f32 %v447_v41 }
 0x58e   :  { %v1456_v45 = vpop.eup %1455 }
 0x5f5   :  { %v457_v43 = vpop.permute.xlu1 %456 }
 0x5f6   :  { %v459_v44 = vadd.f32 %v457_v43, %v453_v42  ;;  %v712_v43 = vcombine.high %v1249_v38, %v1249_v38 }
 0x5f8   :  { %1457 = vtanh.f32 %v459_v44 }
 0x602   :  { %v1458_v46 = vpop.eup %1457 }
 0x603   :  { %v1890_v47 = vmul.f32 %v1458_v46, %v1456_v45 }
 0x605   :  { %470 = vrot.lane.b32.xlu0 %v1890_v47, %s1699_s1 }
 0x677   :  { %v471_v48 = vpop.permute.xlu0 %470 }
 0x678   :  { %1242 = vmatmul.mubr.msk.f32.vlgmr.msra.gmra.mrb[2].mxu1 %vm122_vm1, %v471_v48 }
 0x679   :  { %1348 = vmatpush1.bf16.msra.mxu1 %v1812_v8  ;;  %781 = vmatprep.mubr.f32.mxu1 %v1705_v0 }
 0x67a   :  { %1350 = vmatprep.subr.bf16.mxu1 %v1815_v12 }
 0x67d   :  { %1352 = vmatpush1.bf16.msra.mxu1 %v1819_v15 }
 0x67e   :  { %1354 = vmatprep.subr.bf16.mxu1 %v1823_v16 }
 0x681   :  { %1356 = vmatpush1.bf16.msra.mxu1 %v1828_v22 }
 0x682   :  { %1358 = vmatprep.subr.bf16.mxu1 %v1832_v23 }
 0x685   :  { %1360 = vmatpush1.bf16.msra.mxu1 %v1836_v26 }
 0x686   :  { %1378 = vmatprep.subr.bf16.mxu1 %v1810_v4 }
 0x74b   :  { %v551_v50 = vpop.f32.mrb[2].mxu1 }
 0x74c   :  { %v552_v51 = vadd.f32 %v1241_v49, %v551_v50  ;;  %v553_v52 = vpop.f32.mrb[3].mxu1 }
 0x74d   :  { %v554_v55 = vadd.f32 %v553_v52, %v480_v54 }
 0x74e   :  { %v1243_v53 = vmul.f32 -1.442695, %v552_v51 }
 0x74f   :  { %v1244_v61 = vmul.f32 -1.442695, %v554_v55 }
 0x750   :  { %1459 = vpow2.f32 %v1243_v53 }
 0x751   :  { %1461 = vtanh.f32 %v554_v55 }
 0x75a   :  { %v1460_v56 = vpop.eup %1459 }
 0x75b   :  { %v562_v57 = vadd.f32 1.0, %v1460_v56  ;;  %v1462_v58 = vpop.eup %1461 }
 0x75d   :  { %1463 = vrcp.f32 %v562_v57 }
 0x75e   :  { %1465 = vpow2.f32 %v1244_v61  ;;  %v1253_v61 = vld.sshfl [vmem:[#allocation2 + $0x18] sm:$0x33 pattern:$0x76325410] }
 0x767   :  { %v1464_v59 = vpop.eup %1463 }
 0x768   :  { %v570_v60 = vmul.f32 %v1464_v59, %v1462_v58  ;;  %v1466_v62 = vpop.eup %1465  ;;  %v569_v1 = vmul.f32 %v1464_v59, %v459_v44 }
 0x769   :  { %v563_v63 = vadd.f32 1.0, %v1466_v62 }
 0x76a   :  { %572 = vrot.lane.b32.xlu1 %v570_v60, %s1699_s1 }
 0x76b   :  { %1467 = vrcp.f32 %v563_v63 }
 0x775   :  { %v1468_v5 = vpop.eup %1467 }
 0x7dc   :  { %v573_v2 = vpop.permute.xlu1 %572 }
 0x7dd   :  { %v575_v3 = vadd.f32 %v573_v2, %v569_v1 }
 0x7df   :  { %1469 = vtanh.f32 %v575_v3 }
 0x7e9   :  { %v1470_v6 = vpop.eup %1469 }
 0x7ea   :  { %v1905_v7 = vmul.f32 %v1470_v6, %v1468_v5 }
 0x7ec   :  { %586 = vrot.lane.b32.xlu0 %v1905_v7, %s1699_s1 }
 0x85e   :  { %v587_v9 = vpop.permute.xlu0 %586 }
 0x85f   :  { %1246 = vmatmul.mubr.msk.f32.vlgmr.msra.gmra.mrb[4].mxu0 %vm122_vm1, %v587_v9 }
 0x860   :  { %1364 = vmatpush1.bf16.msra.mxu0 %v1812_v8  ;;  %897 = vmatprep.mubr.f32.mxu0 %v1705_v0 }
 0x861   :  { %1366 = vmatprep.subr.bf16.mxu0 %v1815_v12 }
 0x864   :  { %1368 = vmatpush1.bf16.msra.mxu0 %v1819_v15 }
 0x865   :  { %1370 = vmatprep.subr.bf16.mxu0 %v1823_v16 }
 0x868   :  { %1372 = vmatpush1.bf16.msra.mxu0 %v1828_v22 }
 0x869   :  { %1374 = vmatprep.subr.bf16.mxu0 %v1832_v23 }
 0x86c   :  { %1376 = vmatpush1.bf16.msra.mxu0 %v1836_v26 }
 0x86d   :  { %1394 = vmatprep.subr.bf16.mxu0 %v1810_v4 }
 0x932   :  { %v667_v11 = vpop.f32.mrb[4].mxu0 }
 0x933   :  { %v668_v13 = vadd.f32 %v1245_v10, %v667_v11  ;;  %v669_v14 = vpop.f32.mrb[5].mxu0 }
 0x934   :  { %v670_v19 = vadd.f32 %v669_v14, %v596_v18  ;;  %v1257_v18 = vld.sshfl [vmem:[#allocation2 + $0x1c] sm:$0x33 pattern:$0x76325410] }
 0x935   :  { %v1247_v17 = vmul.f32 -1.442695, %v668_v13 }
 0x936   :  { %v1248_v29 = vmul.f32 -1.442695, %v670_v19 }
 0x937   :  { %1471 = vpow2.f32 %v1247_v17 }
 0x938   :  { %1473 = vtanh.f32 %v670_v19 }
 0x941   :  { %v1472_v20 = vpop.eup %1471 }
 0x942   :  { %v678_v21 = vadd.f32 1.0, %v1472_v20  ;;  %v1474_v25 = vpop.eup %1473 }
 0x944   :  { %1475 = vrcp.f32 %v678_v21 }
 0x945   :  { %1477 = vpow2.f32 %v1248_v29 }
 0x94e   :  { %v1476_v27 = vpop.eup %1475 }
 0x94f   :  { %v686_v28 = vmul.f32 %v1476_v27, %v1474_v25  ;;  %v1478_v4 = vpop.eup %1477  ;;  %v685_v31 = vmul.f32 %v1476_v27, %v575_v3  ;;  %v944_v27 = vcombine.high %v1257_v18, %v1257_v18 }
 0x950   :  { %v679_v30 = vadd.f32 1.0, %v1478_v4 }
 0x951   :  { %688 = vrot.lane.b32.xlu1 %v686_v28, %s1699_s1 }
 0x952   :  { %1479 = vrcp.f32 %v679_v30 }
 0x95c   :  { %v1480_v34 = vpop.eup %1479 }
 0x9c3   :  { %v689_v32 = vpop.permute.xlu1 %688 }
 0x9c4   :  { %v691_v33 = vadd.f32 %v689_v32, %v685_v31 }
 0x9c6   :  { %1481 = vtanh.f32 %v691_v33 }
 0x9d0   :  { %v1482_v35 = vpop.eup %1481 }
 0x9d1   :  { %v1920_v36 = vmul.f32 %v1482_v35, %v1480_v34 }
 0x9d3   :  { %702 = vrot.lane.b32.xlu0 %v1920_v36, %s1699_s1 }
 0xa45   :  { %v703_v37 = vpop.permute.xlu0 %702 }
 0xa46   :  { %1250 = vmatmul.mubr.msk.f32.vlgmr.msra.gmra.mrb[4].mxu1 %vm122_vm1, %v703_v37 }
 0xa47   :  { %1380 = vmatpush1.bf16.msra.mxu1 %v1812_v8  ;;  %1013 = vmatprep.mubr.f32.mxu1 %v1705_v0 }
 0xa48   :  { %1382 = vmatprep.subr.bf16.mxu1 %v1815_v12 }
 0xa4b   :  { %1384 = vmatpush1.bf16.msra.mxu1 %v1819_v15 }
 0xa4c   :  { %1386 = vmatprep.subr.bf16.mxu1 %v1823_v16 }
 0xa4f   :  { %1388 = vmatpush1.bf16.msra.mxu1 %v1828_v22 }
 0xa50   :  { %1390 = vmatprep.subr.bf16.mxu1 %v1832_v23 }
 0xa53   :  { %1392 = vmatpush1.bf16.msra.mxu1 %v1836_v26 }
 0xb19   :  { %v783_v39 = vpop.f32.mrb[4].mxu1 }
 0xb1a   :  { %v784_v40 = vadd.f32 %v1249_v38, %v783_v39  ;;  %v785_v41 = vpop.f32.mrb[5].mxu1 }
 0xb1b   :  { %v786_v44 = vadd.f32 %v785_v41, %v712_v43 }
 0xb1c   :  { %v1251_v42 = vmul.f32 -1.442695, %v784_v40 }
 0xb1d   :  { %v1252_v51 = vmul.f32 -1.442695, %v786_v44 }
 0xb1e   :  { %1483 = vpow2.f32 %v1251_v42 }
 0xb1f   :  { %1485 = vtanh.f32 %v786_v44 }
 0xb28   :  { %v1484_v45 = vpop.eup %1483 }
 0xb29   :  { %v794_v46 = vadd.f32 1.0, %v1484_v45  ;;  %v1486_v48 = vpop.eup %1485 }
 0xb2b   :  { %1487 = vrcp.f32 %v794_v46 }
 0xb2c   :  { %1489 = vpow2.f32 %v1252_v51 }
 0xb35   :  { %v1488_v49 = vpop.eup %1487 }
 0xb36   :  { %v802_v50 = vmul.f32 %v1488_v49, %v1486_v48  ;;  %v1490_v52 = vpop.eup %1489  ;;  %v801_v54 = vmul.f32 %v1488_v49, %v691_v33 }
 0xb37   :  { %v795_v53 = vadd.f32 1.0, %v1490_v52 }
 0xb38   :  { %804 = vrot.lane.b32.xlu1 %v802_v50, %s1699_s1 }
 0xb39   :  { %1491 = vrcp.f32 %v795_v53 }
 0xb43   :  { %v1492_v57 = vpop.eup %1491 }
 0xbaa   :  { %v805_v55 = vpop.permute.xlu1 %804 }
 0xbab   :  { %v807_v56 = vadd.f32 %v805_v55, %v801_v54 }
 0xbad   :  { %1493 = vtanh.f32 %v807_v56 }
 0xbb7   :  { %v1494_v58 = vpop.eup %1493 }
 0xbb8   :  { %v1934_v59 = vmul.f32 %v1494_v58, %v1492_v57 }
 0xbba   :  { %818 = vrot.lane.b32.xlu0 %v1934_v59, %s1699_s1 }
 0xc2c   :  { %v819_v60 = vpop.permute.xlu0 %818 }
 0xc2d   :  { %1254 = vmatmul.mubr.msk.f32.vlgmr.msra.gmra.mrb[6].mxu0 %vm122_vm1, %v819_v60 }
 0xc2e   :  { %1396 = vmatpush1.bf16.msra.mxu0 %v1812_v8  ;;  %1136 = vmatprep.mubr.f32.mxu0 %v1705_v0  ;;  %v828_v8 = vcombine.high %v1253_v61, %v1253_v61 }
 0xc2f   :  { %1398 = vmatprep.subr.bf16.mxu0 %v1815_v12 }
 0xc32   :  { %1400 = vmatpush1.bf16.msra.mxu0 %v1819_v15 }
 0xc33   :  { %1402 = vmatprep.subr.bf16.mxu0 %v1823_v16 }
 0xc36   :  { %1404 = vmatpush1.bf16.msra.mxu0 %v1828_v22 }
 0xc37   :  { %1406 = vmatprep.subr.bf16.mxu0 %v1832_v23 }
 0xc3a   :  { %1408 = vmatpush1.bf16.msra.mxu0 %v1836_v26 }
 0xd00   :  { %v899_v62 = vpop.f32.mrb[6].mxu0 }
 0xd01   :  { %v900_v63 = vadd.f32 %v1253_v61, %v899_v62  ;;  %v901_v1 = vpop.f32.mrb[7].mxu0 }
 0xd02   :  { %v902_v0 = vadd.f32 %v901_v1, %v828_v8 }
 0xd03   :  { %v1255_v2 = vmul.f32 -1.442695, %v900_v63 }
 0xd04   :  { %v1256_v22 = vmul.f32 -1.442695, %v902_v0 }
 0xd05   :  { %1495 = vpow2.f32 %v1255_v2 }
 0xd06   :  { %1497 = vtanh.f32 %v902_v0 }
 0xd0f   :  { %v1496_v3 = vpop.eup %1495 }
 0xd10   :  { %v910_v12 = vadd.f32 1.0, %v1496_v3  ;;  %v1498_v15 = vpop.eup %1497 }
 0xd12   :  { %1499 = vrcp.f32 %v910_v12 }
 0xd13   :  { %1501 = vpow2.f32 %v1256_v22 }
 0xd1c   :  { %v1500_v16 = vpop.eup %1499 }
 0xd1d   :  { %v918_v5 = vmul.f32 %v1500_v16, %v1498_v15  ;;  %v1502_v23 = vpop.eup %1501  ;;  %v917_v6 = vmul.f32 %v1500_v16, %v807_v56 }
 0xd1e   :  { %v911_v26 = vadd.f32 1.0, %v1502_v23 }
 0xd1f   :  { %920 = vrot.lane.b32.xlu1 %v918_v5, %s1699_s1 }
 0xd20   :  { %1503 = vrcp.f32 %v911_v26 }
 0xd2a   :  { %v1504_v11 = vpop.eup %1503 }
 0xd91   :  { %v921_v9 = vpop.permute.xlu1 %920 }
 0xd92   :  { %v923_v10 = vadd.f32 %v921_v9, %v917_v6 }
 0xd94   :  { %1505 = vtanh.f32 %v923_v10 }
 0xd9e   :  { %v1506_v13 = vpop.eup %1505 }
 0xd9f   :  { %v925_v14 = vmul.f32 %v1506_v13, %v1504_v11 }
 0xda1   :  { %934 = vrot.lane.b32.xlu0 %v925_v14, %s1699_s1 }
 0xe13   :  { %v935_v17 = vpop.permute.xlu0 %934 }
 0xe14   :  { %1258 = vmatmul.mubr.msk.f32.vlgmr.msra.gmra.mrb[6].mxu1 %vm122_vm1, %v935_v17 }
 0xee7   :  { %v1015_v19 = vpop.f32.mrb[6].mxu1 }
 0xee8   :  { %v1016_v20 = vadd.f32 %v1257_v18, %v1015_v19  ;;  %v1017_v21 = vpop.f32.mrb[7].mxu1 }
 0xee9   :  { %v1018_v28 = vadd.f32 %v1017_v21, %v944_v27 }
 0xeea   :  { %v1259_v25 = vmul.f32 -1.442695, %v1016_v20 }
 0xeeb   :  { %v1260_v33 = vmul.f32 -1.442695, %v1018_v28 }
 0xeec   :  { %1507 = vpow2.f32 %v1259_v25 }
 0xeed   :  { %1509 = vtanh.f32 %v1018_v28 }
 0xef6   :  { %v1508_v29 = vpop.eup %1507 }
 0xef7   :  { %v1026_v4 = vadd.f32 1.0, %v1508_v29  ;;  %v1510_v30 = vpop.eup %1509 }
 0xef9   :  { %1511 = vrcp.f32 %v1026_v4 }
 0xefa   :  { %1513 = vpow2.f32 %v1260_v33 }
 0xf03   :  { %v1512_v31 = vpop.eup %1511 }
 0xf04   :  { %v1034_v32 = vmul.f32 %v1512_v31, %v1510_v30  ;;  %v1514_v34 = vpop.eup %1513  ;;  %v1033_v37 = vmul.f32 %v1512_v31, %v923_v10 }
 0xf05   :  { %v1027_v35 = vadd.f32 1.0, %v1514_v34 }
 0xf06   :  { %1036 = vrot.lane.b32.xlu1 %v1034_v32, %s1699_s1 }
 0xf07   :  { %1515 = vrcp.f32 %v1027_v35 }
 0xf11   :  { %v1516_v40 = vpop.eup %1515 }
 0xf78   :  { %v1037_v38 = vpop.permute.xlu1 %1036 }
 0xf79   :  { %v1039_v39 = vadd.f32 %v1037_v38, %v1033_v37 }
 0xf7b   :  { %1517 = vtanh.f32 %v1039_v39 }
 0xf85   :  { %v1518_v41 = vpop.eup %1517 }
 0xf86   :  { %v1041_v42 = vmul.f32 %v1518_v41, %v1516_v40 }
 0xf88   :  { %1048 = vrot.lane.b32.xlu0 %v1041_v42, %s1699_s1 }
 0xf8c   :  { %463 = vrot.lane.b32.xlu0 %v1890_v47, %s1696_s7  ;;  %v1261_v47 = vld.sshfl [vmem:[#allocation2 + $0x20] sm:$0x33 pattern:$0x76325410] }
 0xf8d   :  { %v1067_v51 = vcombine.high %v1261_v47, %v1261_v47 }
 0xf90   :  { %695 = vrot.lane.b32.xlu0 %v1920_v36, %s1696_s7 }
 0xf94   :  { %927 = vrot.lane.b32.xlu0 %v925_v14, %s1696_s7 }
 0xffa   :  { %v1049_v43 = vpop.permute.xlu0 %1048 }
 0xffb   :  { %1051 = vst.msk [vmem:[#allocation11] sm:$0x3] %vm350_vm2, %v1049_v43  ;;  %1262 = vmatmul.mubr.msk.f32.vlgmr.msra.gmra.mrb[8].mxu0 %vm122_vm1, %v1049_v43 }
 0xffe   :  { %v464_v44 = vpop.permute.xlu0 %463 }
 0xfff   :  { %467 = vst.msk [vmem:[#allocation10 + $0x2] sm:$0x3] %vm350_vm2, %v464_v44 }
0x1002   :  { %v696_v45 = vpop.permute.xlu0 %695 }
0x1003   :  { %699 = vst.msk [vmem:[#allocation10 + $0x6] sm:$0x3] %vm350_vm2, %v696_v45 }
0x1006   :  { %v928_v46 = vpop.permute.xlu0 %927 }
0x1007   :  { %931 = vst.msk [vmem:[#allocation10 + $0xa] sm:$0x3] %vm350_vm2, %v928_v46 }
0x10ce   :  { %v1138_v48 = vpop.f32.mrb[8].mxu0 }
0x10cf   :  { %v1139_v36 = vadd.f32 %v1261_v47, %v1138_v48  ;;  %v1140_v49 = vpop.f32.mrb[9].mxu0 }
0x10d0   :  { %v1141_v52 = vadd.f32 %v1140_v49, %v1067_v51 }
0x10d1   :  { %v1263_v50 = vmul.f32 -1.442695, %v1139_v36 }
0x10d2   :  { %v1264_v58 = vmul.f32 -1.442695, %v1141_v52 }
0x10d3   :  { %1519 = vpow2.f32 %v1263_v50 }
0x10d4   :  { %1521 = vtanh.f32 %v1141_v52 }
0x10dd   :  { %v1520_v53 = vpop.eup %1519 }
0x10de   :  { %v1149_v54 = vadd.f32 1.0, %v1520_v53  ;;  %v1522_v55 = vpop.eup %1521 }
0x10e0   :  { %1523 = vrcp.f32 %v1149_v54 }
0x10e1   :  { %1525 = vpow2.f32 %v1264_v58 }
0x10ea   :  { %v1524_v56 = vpop.eup %1523 }
0x10eb   :  { %v1157_v57 = vmul.f32 %v1524_v56, %v1522_v55  ;;  %v1526_v60 = vpop.eup %1525  ;;  %v1156_v62 = vmul.f32 %v1524_v56, %v1039_v39 }
0x10ec   :  { %v1150_v61 = vadd.f32 1.0, %v1526_v60 }
0x10ed   :  { %1159 = vrot.lane.b32.xlu1 %v1157_v57, %s1699_s1 }
0x10ee   :  { %1527 = vrcp.f32 %v1150_v61 }
0x10f1   :  { %347 = vrot.lane.b32.xlu1 %v1875_v24, %s1696_s7 }
0x10f5   :  { %579 = vrot.lane.b32.xlu1 %v1905_v7, %s1696_s7 }
0x10f9   :  { %811 = vrot.lane.b32.xlu1 %v1934_v59, %s1696_s7  ;;  %v1528_v59 = vpop.eup %1527 }
0x10fd   :  { %1043 = vrot.lane.b32.xlu1 %v1041_v42, %s1696_s7 }
0x115f   :  { %v1160_v63 = vpop.permute.xlu1 %1159 }
0x1160   :  { %v1162_v1 = vadd.f32 %v1160_v63, %v1156_v62 }
0x1162   :  { %1529 = vtanh.f32 %v1162_v1  ;;  %1174 = vrot.lane.b32.xlu1 %v1162_v1, %s1696_s7 }
0x1163   :  { %v348_v24 = vpop.permute.xlu1 %347 }
0x1164   :  { %351 = vst.msk [vmem:[#allocation10] sm:$0x3] %vm350_vm2, %v348_v24 }
0x1167   :  { %v580_v7 = vpop.permute.xlu1 %579 }
0x1168   :  { %583 = vst.msk [vmem:[#allocation10 + $0x4] sm:$0x3] %vm350_vm2, %v580_v7 }
0x116b   :  { %v812_v2 = vpop.permute.xlu1 %811 }
0x116c   :  { %v1530_v8 = vpop.eup %1529  ;;  %815 = vst.msk [vmem:[#allocation10 + $0x8] sm:$0x3] %vm350_vm2, %v812_v2 }
0x116d   :  { %v1164_v0 = vmul.f32 %v1530_v8, %v1528_v59 }
0x116f   :  { %v1044_v3 = vpop.permute.xlu1 %1043  ;;  %1166 = vrot.lane.b32.xlu0 %v1164_v0, %s1696_s7 }
0x1170   :  { %1047 = vst.msk [vmem:[#allocation10 + $0xc] sm:$0x3] %vm350_vm2, %v1044_v3 }
0x1173   :  { %1053 = vrot.lane.b32.xlu0 %v1039_v39, %s1699_s1  ;;  %s1619_s1 = scalar_lea.vmem %s1197_s26, 64 }
0x1174   :  { %p1620_p4 = scmp.ne.s32.totalorder %s1197_s26, %s1619_s1  ;;  %p1625_p6 = scmp.lt.s32.totalorder %s1619_s1, %s1619_s1 }
0x1176   :  { %p1626_p7 = por %p1625_p6, %p1624_p5 }
0x1178   :  { %p1627_p8 = pnand %p1626_p7, %p1620_p4 }
0x11d4   :  { %v1175_v12 = vpop.permute.xlu1 %1174 }
0x11d5   :  { %1178 = vst.msk [vmem:[#allocation13 + $0x2] sm:$0x3] %vm350_vm2, %v1175_v12 }
0x11e1   :  { %v1167_v15 = vpop.permute.xlu0 %1166 }
0x11e2   :  { %1170 = vst.msk [vmem:[#allocation10 + $0xe] sm:$0x3] %vm350_vm2, %v1167_v15  ;;  %1172 = vst.msk [vmem:[#allocation11 + $0x2] sm:$0x3] %vm350_vm2, %v1167_v15 }
0x11e3   :  { %1630 = shalt.err (!%p1627_p8)
}
0x11e4   :  { %s1631_s11 = scalar_lea.hbm %s2045_s5, 64 }
0x11e5   :  { %p1632_p9 = scmp.ne.s32.totalorder %s2045_s5, %s1631_s11  ;;  %p1635_p10 = scmp.lt.u32.totalorder %s1631_s11, %s2045_s5 }
0x11e7   :  { %p1637_p11 = pnand %p1635_p10, %p1632_p9 }
0x11e9   :  { %1640 = shalt.err (!%p1637_p11)
}
0x11ea   :  { %1202 = dma.vmem_to_hbm [thread:$0]  %s1197_s26, 64, %s2045_s5, [#allocation12], %s1696_s7, %s1696_s7, %s1697_s8  }
0x11eb   :  { %s1641_s17 = scalar_lea.vmem %s1978_s28, 256  ;;  %p1646_p13 = scmp.lt.s32.totalorder %s1978_s28, %s1978_s28 }
0x11ec   :  { %p1642_p12 = scmp.ne.s32.totalorder %s1978_s28, %s1641_s17  ;;  %p1647_p0 = scmp.lt.s32.totalorder %s1641_s17, %s1641_s17 }
0x11ee   :  { %p1648_p1 = por %p1647_p0, %p1646_p13 }
0x11f0   :  { %p1649_p2 = pnand %p1648_p1, %p1642_p12 }
0x11f2   :  { %1652 = shalt.err (!%p1649_p2)
}
0x11f3   :  { %s1653_s20 = scalar_lea.hbm %s2044_s4, 256 }
0x11f4   :  { %p1654_p3 = scmp.ne.s32.totalorder %s2044_s4, %s1653_s20  ;;  %p1657_p4 = scmp.lt.u32.totalorder %s1653_s20, %s2044_s4 }
0x11f6   :  { %p1659_p5 = pnand %p1657_p4, %p1654_p3 }
0x11f8   :  { %1662 = shalt.err (!%p1659_p5)
}
0x11f9   :  { %1190 = dma.vmem_to_hbm [thread:$0]  %s1978_s28, 256, %s2044_s4, [#allocation4], %s1696_s7, %s1696_s7, %s1697_s8   ;;  %v1054_v16 = vpop.permute.xlu0 %1053 }
0x11fa   :  { %1056 = vst.msk [vmem:[#allocation13] sm:$0x3] %vm350_vm2, %v1054_v16  ;;  %s1663_s25 = scalar_lea.vmem %s1982_s30, 64  ;;  %p1668_p7 = scmp.lt.s32.totalorder %s1982_s30, %s1982_s30 }
0x11fb   :  { %p1664_p6 = scmp.ne.s32.totalorder %s1982_s30, %s1663_s25  ;;  %p1669_p8 = scmp.lt.s32.totalorder %s1663_s25, %s1663_s25 }
0x11fd   :  { %p1670_p9 = por %p1669_p8, %p1668_p7 }
0x11ff   :  { %p1671_p10 = pnand %p1670_p9, %p1664_p6 }
0x1201   :  { %1674 = shalt.err (!%p1671_p10)
}
0x1202   :  { %s1675_s27 = scalar_lea.hbm %s2046_s6, 64 }
0x1203   :  { %p1676_p11 = scmp.ne.s32.totalorder %s2046_s6, %s1675_s27  ;;  %p1679_p12 = scmp.lt.u32.totalorder %s1675_s27, %s2046_s6 }
0x1205   :  { %p1681_p13 = pnand %p1679_p12, %p1676_p11 }
0x1207   :  { %1684 = shalt.err (!%p1681_p13)
}
0x1208   :  { %1214 = dma.vmem_to_hbm [thread:$0]  %s1982_s30, 64, %s2046_s6, [#allocation12], %s1696_s7, %s1696_s7, %s1697_s8  }
0x1209   :  { %1691 = dma.done.wait [#allocation4], 256  }
0x120a   :  { %1692 = vsyncadd [#allocation4], 4294967040 }
0x120b   :  { %1693 = dma.done.wait [#allocation12], 128  }
0x120c   :  { %1694 = vsyncadd [#allocation12], 4294967168 }
0x120d   :  { %1224 = vsyncpa [#allocation3], 1 }
0x120e   :  { %1225 = vsyncpa [#allocation6], 1 }
0x120f   :  { %1226 = vsyncpa [#allocation9], 1 }
0x1210   :  { %1227 = vsyncpa [#allocation4], 1 }
0x1211   :  { %1228 = vsyncpa [#allocation12], 1 }

</bundles_post_ra>
